<compile_context>
chip_gen: v7x
topology: tpu7x:2x2x1
jax: 0.10.0
libtpu: 0.0.40
codegen_flags: <defaults>
</compile_context>

<pallas_src>
import functools

import numpy as np
import jax
import jax.numpy as jnp
from jax import lax
from jax.experimental import pallas as pl
from jax.experimental.pallas import tpu as pltpu


_TARGET_BLOCK_BYTES = 3 << 20     # ~3 MiB of OUTPUT per grid step
_R_MAX_BYTES = 8 << 20            # cap on the resident replication matrix


# --------------------------------------------------------------------------- helpers

def _round_up(n, m):
    return -(-n // m) * m


def _pick_fold(total_rows, row_out):
    """Smallest g | total_rows that makes the folded output row lane-friendly.

    Prefers (g*row_out) % 128 == 0 (fully unmasked stores), else g*row_out >= 128,
    else 1.  row_out = factor^2 * W output elements per input row.
    """
    if row_out % 128 == 0:
        return 1
    limit = min(total_rows, 256)
    for g in range(2, limit + 1):
        if total_rows % g == 0 and (g * row_out) % 128 == 0:
            return g
    if row_out >= 128:
        return 1
    need = -(-128 // row_out)
    for g in range(need, min(total_rows, 4 * need) + 1):
        if total_rows % g == 0:
            return g
    return 1


def _full_repl_matrix(W, factor, g, dtype):
    """R[(r*W + w), (r*f^2*W + fh*W*f + w*f + fw)] = 1  -- full nearest-neighbour copy."""
    Wf = W * factor
    row_out = factor * Wf
    rows, cols = g * W, g * row_out
    row_idx = np.repeat(np.arange(rows), factor * factor)
    r, w = row_idx // W, row_idx % W
    k = np.tile(np.arange(factor * factor), rows)
    fh, fw = k // factor, k % factor
    col_idx = r * row_out + fh * Wf + w * factor + fw
    R = np.zeros((rows, cols), dtype=np.float32)
    R[row_idx, col_idx] = 1.0
    return jnp.asarray(R, dtype=dtype)


def _width_repl_matrix(W, factor, dtype):
    """R_w[w, w*f + fw] = 1  -- width-only replication (separable path)."""
    Wf = W * factor
    row_idx = np.repeat(np.arange(W), factor)
    col_idx = row_idx * factor + np.tile(np.arange(factor), W)
    R = np.zeros((W, Wf), dtype=np.float32)
    R[row_idx, col_idx] = 1.0
    return jnp.asarray(R, dtype=dtype)


def _vmem_limit_bytes(in_block, out_block, r_bytes=0):
    # ~double-buffered in/out (+1 out), resident R (x2 buffers), compiler slack.
    # Cap at 48 MiB so v7x's 64 MiB/TC is never fully reserved; 16 MiB floor is
    # harmless everywhere (== v5e's default scoped limit).
    need = 3 * (in_block + out_block) + 2 * r_bytes + (4 << 20)
    return int(min(48 << 20, max(need, 16 << 20)))


# --------------------------------------------------------------------------- kernels

def _mxu_full_kernel(x_ref, r_ref, o_ref, *, gain, precision):
    # x_ref: (rb, g*W)   r_ref: (g*W, g*f^2*W)   o_ref: (rb, g*f^2*W)
    x = x_ref[...]
    if gain != 1:
        x = x * jnp.asarray(gain, dtype=x.dtype)
    y = lax.dot_general(x, r_ref[...], (((1,), (0,)), ((), ())),
                        preferred_element_type=jnp.float32,
                        precision=precision)
    o_ref[...] = y.astype(o_ref.dtype)


def _mxu_sep_kernel(x_ref, r_ref, o_ref, *, factor, gain, precision):
    # x_ref: (rb, W)   r_ref: (W, W*f)   o_ref: (rb, f^2*W)
    x = x_ref[...]
    if gain != 1:
        x = x * jnp.asarray(gain, dtype=x.dtype)
    xw = lax.dot_general(x, r_ref[...], (((1,), (0,)), ((), ())),
                         preferred_element_type=jnp.float32,
                         precision=precision).astype(o_ref.dtype)
    wf = xw.shape[-1]
    for fh in range(factor):
        o_ref[:, fh * wf:(fh + 1) * wf] = xw


def _shuffle_kernel(x_ref, o_ref, *, factor, gain):
    # Fallback (integer dtypes / replication matrix too large): width interleave on
    # the VPU/XLU + `factor` contiguous lane-slice stores for the height copies.
    x = x_ref[...]
    if gain != 1:
        x = x * jnp.asarray(gain, dtype=x.dtype)
    rb, w = x.shape
    wf = w * factor
    xw = jnp.broadcast_to(x[:, :, None], (rb, w, factor)).reshape(rb, wf)
    xw = xw.astype(o_ref.dtype)
    for fh in range(factor):
        o_ref[:, fh * wf:(fh + 1) * wf] = xw


# --------------------------------------------------------------------------- wrapper

def upscale2d(x, factor=2, gain=1, *,
              block_bytes=_TARGET_BLOCK_BYTES,
              repl_matrix_bytes=_R_MAX_BYTES):
    """Pallas TPU equivalent of the PyTorch upscale2d(x, factor, gain)."""
    assert x.ndim == 4
    assert isinstance(factor, int) and factor >= 1
    N, C, H, W = x.shape
    dtype = x.dtype

    # factor == 1 is (at most) a scale -- skip the kernel launch entirely.
    if factor == 1:
        return x if gain == 1 else x * jnp.asarray(gain, dtype=dtype)

    Hf, Wf = H * factor, W * factor
    itemsize = jnp.dtype(dtype).itemsize
    sub = 8 * max(1, 4 // itemsize)       # sublane granularity: 8 f32 / 16 bf16
    total_rows = N * C * H
    row_out = factor * Wf                 # output elems produced per input row

    # ---- pick replication strategy ----
    use_mxu = (dtype == jnp.float32) or (dtype == jnp.bfloat16)
    path, g = "shuffle", 1
    if use_mxu:
        gg = _pick_fold(total_rows, row_out)
        if (gg * W) * (gg * row_out) * itemsize <= repl_matrix_bytes:
            path, g = "full", gg
        elif Wf >= 128 and W * Wf * itemsize <= repl_matrix_bytes:
            path = "sep"

    n_rows = total_rows // g
    in_cols = g * W
    out_cols = g * row_out
    out_row_bytes = out_cols * itemsize

    # ---- row-block: ~block_bytes of output, sublane-aligned, >=2 grid steps ----
    rb = max(sub, (max(1, block_bytes // out_row_bytes) // sub) * sub)
    if n_rows > sub:
        rb = min(rb, _round_up(-(-n_rows // 2), sub))   # >=2 steps (v7x: 2 TCs)
    if rb >= n_rows:
        rb = n_rows                                     # single block == full dim
    grid = (pl.cdiv(n_rows, rb),)                       # ragged last block is masked

    in_block = rb * in_cols * itemsize
    out_block = rb * out_cols * itemsize

    x2d = x.reshape(n_rows, in_cols)
    out_struct = jax.ShapeDtypeStruct((n_rows, out_cols), dtype)
    prec = lax.Precision.HIGHEST if dtype == jnp.float32 else None

    if path == "shuffle":
        kern = functools.partial(_shuffle_kernel, factor=factor, gain=gain)
        out2d = pl.pallas_call(
            kern,
            out_shape=out_struct,
            grid_spec=pltpu.PrefetchScalarGridSpec(
                num_scalar_prefetch=0,
                grid=grid,
                in_specs=[pl.BlockSpec((rb, in_cols), lambda i: (i, 0))],
                out_specs=pl.BlockSpec((rb, out_cols), lambda i: (i, 0)),
            ),
            compiler_params=pltpu.CompilerParams(
                dimension_semantics=("parallel",),
                vmem_limit_bytes=_vmem_limit_bytes(in_block, out_block),
            ),
        )(x2d)
    else:
        if path == "full":
            R = _full_repl_matrix(W, factor, g, dtype)
            kern = functools.partial(_mxu_full_kernel, gain=gain, precision=prec)
        else:  # separable width matrix + factor contiguous slice stores
            R = _width_repl_matrix(W, factor, dtype)
            kern = functools.partial(_mxu_sep_kernel, factor=factor, gain=gain,
                                     precision=prec)
        r_rows, r_cols = R.shape
        out2d = pl.pallas_call(
            kern,
            out_shape=out_struct,
            grid_spec=pltpu.PrefetchScalarGridSpec(
                num_scalar_prefetch=0,
                grid=grid,
                in_specs=[
                    pl.BlockSpec((rb, in_cols), lambda i: (i, 0)),
                    pl.BlockSpec((r_rows, r_cols), lambda i: (0, 0)),  # resident R
                ],
                out_specs=pl.BlockSpec((rb, out_cols), lambda i: (i, 0)),
            ),
            compiler_params=pltpu.CompilerParams(
                dimension_semantics=("parallel",),
                vmem_limit_bytes=_vmem_limit_bytes(
                    in_block, out_block, r_rows * r_cols * itemsize),
            ),
        )(x2d, R)

    return out2d.reshape(N, C, Hf, Wf)


class Upscale2d:
    """Stateless module mirroring the PyTorch Upscale2d (no parameters)."""

    def __init__(self, factor=2, gain=1):
        assert isinstance(factor, int) and factor >= 1
        self.factor = factor
        self.gain = gain

    def __call__(self, x):
        return upscale2d(x, factor=self.factor, gain=self.gain)


# --------------------------------------------------------------------------- reference / tests

def _upscale2d_ref(x, factor=2, gain=1):
    # pure-JAX reference matching the torch view/expand/view semantics
    if gain != 1:
        x = x * jnp.asarray(gain, dtype=x.dtype)
    if factor != 1:
        n, c, h, w = x.shape
        x = jnp.broadcast_to(x[:, :, :, None, :, None], (n, c, h, factor, w, factor))
        x = x.reshape(n, c, h * factor, w * factor)
    return x


def _check(x, factor, gain, rtol=1e-5, atol=1e-6, **kw):
    out = jax.block_until_ready(upscale2d(x, factor=factor, gain=gain, **kw))
    ref = _upscale2d_ref(x, factor=factor, gain=gain)
    assert out.shape == ref.shape, (out.shape, ref.shape)
    assert out.dtype == x.dtype, out.dtype
    assert jnp.allclose(out.astype(jnp.float32), ref.astype(jnp.float32),
                        rtol=rtol, atol=atol), \
        f"mismatch (factor={factor}, gain={gain}, shape={x.shape}, dtype={x.dtype})"


if __name__ == "__main__":
    key = jax.random.PRNGKey(0)
    k1, k2, k3, k4, k5 = jax.random.split(key, 5)

    # primary case (module defaults): MXU full-replication path, g-folded 128-lane
    # output rows, 2 parallel grid steps.
    x = jax.random.normal(k1, (2, 4, 16, 16), dtype=jnp.float32)
    mod = Upscale2d(factor=2, gain=1)
    out = jax.block_until_ready(mod(x))
    ref = _upscale2d_ref(x, factor=2, gain=1)
    assert out.shape == (2, 4, 32, 32), out.shape
    assert out.dtype == x.dtype
    assert jnp.allclose(out, ref, rtol=1e-5, atol=1e-6), "mismatch vs reference"

    # bf16, wide rows (no fold needed), non-unit gain.
    _check(jax.random.normal(k2, (1, 2, 8, 64), dtype=jnp.bfloat16),
           factor=2, gain=2.0, rtol=2e-2, atol=2e-2)

    # awkward shape: g-fold + ragged cdiv grid (last block masked).
    _check(jax.random.normal(k3, (1, 3, 20, 24), dtype=jnp.float32), factor=2, gain=1)

    # separable width-matrix MXU path, forced via a small replication-matrix cap.
    _check(jax.random.normal(k4, (1, 2, 32, 64), dtype=jnp.float32), factor=2, gain=1,
           repl_matrix_bytes=40 << 10)

    # non-power-of-two factor + fractional gain on the full-matrix path.
    _check(jax.random.normal(k5, (1, 1, 8, 8), dtype=jnp.float32), factor=3, gain=0.5)

    # integer dtype -> shuffle fallback (v7x MXU has no int path).
    xi = jax.random.randint(k1, (1, 2, 8, 16), -100, 100, dtype=jnp.int32)
    _check(xi, factor=2, gain=1, rtol=0.0, atol=0.0)

    # factor == 1 early-out (pure scale, no kernel launch).
    _check(x, factor=1, gain=3.0)

    print("KERNEL_OK")
</pallas_src>

<mosaic_0001>
module attributes {stable_mosaic.version = 11 : i64} {
  func.func @_mxu_full_kernel(%arg0: i32, %arg1: memref<32x32xf32, #tpu.memory_space<vmem>>, %arg2: memref<32x128xf32, #tpu.memory_space<vmem>>, %arg3: memref<32x128xf32, #tpu.memory_space<vmem>>) attributes {dimension_semantics = [#tpu.dimension_semantics<parallel>], iteration_bounds = array<i64: 2>, scalar_prefetch = 0 : i64, scratch_operands = 0 : i64, tpu.core_type = #tpu.core_type<tc>, window_params = [{transform_indices = @transform_0, window_bounds = array<i64: 32, 32>}, {pipeline_mode = #tpu.pipeline_mode<synchronous>, transform_indices = @transform_1, window_bounds = array<i64: 32, 128>}, {transform_indices = @transform_2, window_bounds = array<i64: 32, 128>}]} {
    %c0 = arith.constant 0 : index
    %c0_0 = arith.constant 0 : index
    %0 = vector.load %arg1[%c0, %c0_0] : memref<32x32xf32, #tpu.memory_space<vmem>>, vector<32x32xf32>
    %c0_1 = arith.constant 0 : index
    %c0_2 = arith.constant 0 : index
    %1 = vector.load %arg2[%c0_1, %c0_2] : memref<32x128xf32, #tpu.memory_space<vmem>>, vector<32x128xf32>
    %cst = arith.constant dense<0.000000e+00> : vector<32x128xf32>
    %2 = tpu.matmul %0, %1, %cst {dimension_numbers = #tpu.dot_dimension_numbers<[1], [0], [0], [1], [0, 0, 1, 1], [], []>, precision = #tpu.contract_precision<fp32>} : vector<32x32xf32>, vector<32x128xf32>, vector<32x128xf32> -> vector<32x128xf32>
    %c0_3 = arith.constant 0 : index
    %c0_4 = arith.constant 0 : index
    %3 = vector.load %arg3[%c0_3, %c0_4] : memref<32x128xf32, #tpu.memory_space<vmem>>, vector<32x128xf32>
    tpu.vector_store %arg3[%c0_3, %c0_4], %2 {strides = array<i32>} : memref<32x128xf32, #tpu.memory_space<vmem>>, vector<32x128xf32>,
    return
  }
  func.func @transform_0(%arg0: i32) -> (i32, i32) {
    %c0_i32 = arith.constant 0 : i32
    %c0_i32_0 = arith.constant 0 : i32
    return %arg0, %c0_i32 : i32, i32
  }
  func.func @transform_1(%arg0: i32) -> (i32, i32) {
    %c0_i32 = arith.constant 0 : i32
    %c0_i32_0 = arith.constant 0 : i32
    %c0_i32_1 = arith.constant 0 : i32
    return %c0_i32, %c0_i32_0 : i32, i32
  }
  func.func @transform_2(%arg0: i32) -> (i32, i32) {
    %c0_i32 = arith.constant 0 : i32
    %c0_i32_0 = arith.constant 0 : i32
    return %arg0, %c0_i32 : i32, i32
  }
}

</mosaic_0001>

<bundles_post_ra>
// kernel: tpu_custom_call.1
= control target key start
LH: loop header
LB: loop body
LE: loop exit
PB: predicated region body
PF: predicated region fallthrough
CT: control target
= control target key end

     0   :  { %7 = vsyncpa [#allocation3], 0  ;;  %s1362_s0 = inlined_call_operand.vmem [shape: f32[64,32], index: 0, kind: input, shape index: {}]   ;;  %s1363_s1 = inlined_call_operand.vmem [shape: f32[32,128], index: 1, kind: input, shape index: {}]   ;;  %s1364_s2 = inlined_call_operand.hbm [shape: f32[64,128], index: 2, kind: output, shape index: {}]  }
   0x1   :  { %9 = vsyncpa [#allocation3 + $0x1], 0  ;;  %s1196_s9 = smov 0   ;;  %s1198_s10 = smov 0  }
   0x2   :  { %s1200_s11 = smov 0   ;;  %s1202_s12 = smov 0  }
   0x3 LB: > { %s1217_s13 = sadd.s32 4294967295, %s1176_s12   ;;  %s860_s14 = sadd.s32 4294967294, %s1176_s12   ;;  %s1176_s12 = sphi %s1202_s12, %s1370_s12   ;;  %s1172_s11 = sphi %s1200_s11, %s1369_s11   ;;  %s1168_s10 = sphi %s1198_s10, %s1368_s10   ;;  %s1164_s9 = sphi %s1196_s9, %s1367_s9  }
   0x4   : > { %s1221_s15 = sadd.s32 1, %s1176_s12   ;;  %s69_s16 = sadd.s32 1, %s1172_s11 }
   0x5   : > { %s66_s17 = ssub.s32 %s1176_s12, %s1221_s15  ;;  %p79_p0 = scmp.ne.s32.totalorder %s1172_s11, %s1168_s10 }
   0x6   : > { %p67_p1 = scmp.eq.s32.totalorder %s66_s17, 0  ;;  %p80_p2 = scmp.eq.s32.totalorder %s1217_s13, 1 }
   0x7   : > { %p85_p3 = scmp.ne.s32.totalorder %s1168_s10, %s1164_s9  ;;  %p86_p4 = scmp.eq.s32.totalorder %s860_s14, 1 }
   0x8   : > { %s1232_s18 = scalar_select %p67_p1, %s1172_s11, %s69_s16  }
   0x9   : > { %p1234_p5 = por %p80_p2, %p79_p0  ;;  %p1238_p6 = por %p86_p4, %p85_p3 }
   0xa   : > { %p863_p7 = scmp.ge.s32.totalorder %s1176_s12, 1  ;;  %p116_p8 = scmp.lt.s32.totalorder %s1176_s12, 3 }
   0xc   : > { %p117_p9 = pnand %p863_p7, %p116_p8 }
   0xd   : > { %v149_v0 = vld [vmem:[%s1363_s1] sm:$0xff] (!%p117_p9)  ;;  %v150_v1 = vld [vmem:[%s1363_s1 + $0x8] sm:$0xff] (!%p117_p9)  ;;  %v151_v2 = vld [vmem:[%s1363_s1 + $0x10] sm:$0xff] (!%p117_p9)  ;;  %s865_s27 = sshll.u32 (!%p117_p9), %s1217_s13, 2  ;;  %vm153_vm0 = vcmask (!%p117_p9), 261120   ;;  %s135_s6 = sand.u32 (!%p117_p9), 1, %s1168_s10  }
   0xe   : > { %120 = sbr.rel (%p117_p9) target bundleno = 287 (0x11f), region = 28  ;;  %v167_v3 = vand.u32 (!%p117_p9), 4294901760, %v149_v0  ;;  %v170_v4 = vand.u32 (!%p117_p9), 4294901760, %v150_v1  ;;  %v152_v5 = vld [vmem:[%s1363_s1 + $0x18] sm:$0xff] (!%p117_p9)  ;;  %v173_v6 = vand.u32 (!%p117_p9), 4294901760, %v151_v2  ;;  %p139_p10 = scmp.lt.s32.totalorder (!%p117_p9), %s865_s27, 7 }
   0xf   : > { %v176_v7 = vand.u32 (!%p117_p9), 4294901760, %v152_v5  ;;  %s864_s7 = sshll.u32 (!%p117_p9), %s135_s6, 5  ;;  %s872_s16 = sshll.u32 (!%p117_p9), %s1217_s13, 9 }
  0x10   : > { %v1257_v8 = vpack.c.bf16 (!%p117_p9), %v170_v4, %v167_v3  ;;  %v1259_v9 = vsub.f32 (!%p117_p9), %v149_v0, %v167_v3  ;;  %v1261_v10 = vsub.f32 (!%p117_p9), %v150_v1, %v170_v4  ;;  %v1263_v11 = vsub.f32 (!%p117_p9), %v151_v2, %v173_v6  ;;  %s137_s8 = scalar_lea.vmem (!%p117_p9), [#allocation2], %s864_s7  ;;  %s1319_s22 = scalar_lea.hbm (!%p117_p9), %s1364_s2, %s872_s16 }
  0x11   : > { %v1265_v12 = vpack.c.bf16 (!%p117_p9), %v176_v7, %v173_v6  ;;  %v1267_v13 = vsub.f32 (!%p117_p9), %v152_v5, %v176_v7  ;;  %s798_s14 = sshll.u32 (!%p117_p9), %s137_s8, 4  ;;  %s1321_s23 = scalar_lea.sflag (!%p117_p9), [#allocation3], %s135_s6  ;;  %s1314_s14 = int_to_ptr.vmem [resolvable:$true] %s798_s14 }
  0x12   : > { %1030 = vmatprep.subr.bf16.mxu0 (!%p117_p9), %v1257_v8  ;;  %1006 = vmatprep.subr.bf16.mxu1 (!%p117_p9), %v1257_v8  ;;  %v278_v14 = vand.u32 (!%p117_p9), 4294901760, %v1259_v9  ;;  %v285_v15 = vand.u32 (!%p117_p9), 4294901760, %v1261_v10  ;;  %v292_v16 = vand.u32 (!%p117_p9), 4294901760, %v1263_v11  ;;  %v1021_v58 = vpack.c.bf16 (!%p117_p9), %v1261_v10, %v1259_v9  ;;  %s1114_s13 = scalar_lea.vmem (!%p117_p9), %s1314_s14, 512  ;;  %s1178_s24 = smov (!%p117_p9), [#allocation2]  }
  0x13   : > { %1032 = vmatpush3.bf16.msra.mxu0 (!%p117_p9), %v1257_v8  ;;  %1008 = vmatpush3.bf16.msra.mxu1 (!%p117_p9), %v1257_v8  ;;  %v299_v17 = vand.u32 (!%p117_p9), 4294901760, %v1267_v13  ;;  %v1025_v59 = vpack.c.bf16 (!%p117_p9), %v1267_v13, %v1263_v11  ;;  %p1115_p11 = scmp.ne.s32.totalorder (!%p117_p9), %s1314_s14, %s1114_s13  ;;  %s1118_s25 = sshll.u32 (!%p117_p9), %s1178_s24, 4  ;;  %s1119_s25 = int_to_ptr.vmem [resolvable:$false] %s1118_s25 }
  0x14   : > { %1034 = vmatprep.subr.bf16.mxu0 (!%p117_p9), %v1265_v12  ;;  %1010 = vmatprep.subr.bf16.mxu1 (!%p117_p9), %v1265_v12  ;;  %v1037_v20 = vpack.c.bf16 (!%p117_p9), %v285_v15, %v278_v14  ;;  %v279_v21 = vsub.f32 (!%p117_p9), %v1259_v9, %v278_v14  ;;  %v286_v22 = vsub.f32 (!%p117_p9), %v1261_v10, %v285_v15  ;;  %s1120_s26 = scalar_lea.vmem (!%p117_p9), %s1119_s25, 1024  ;;  %p1121_p0 = scmp.lt.s32.totalorder (!%p117_p9), %s1314_s14, %s1119_s25 }
  0x15   : > { %s1372_s27 = smov (!%p139_p10, %s865_s27), 7  ;;  %v293_v34 = vsub.f32 %v1263_v11, %v292_v16  ;;  %v300_v35 = vsub.f32 %v1267_v13, %v299_v17  ;;  %v1041_v45 = vpack.c.bf16 %v299_v17, %v292_v16  ;;  %p1116_p12 = pnand %p1115_p11, %p1234_p5 }
  0x16   : > { %s866_s30 = sshll.u32 %s1372_s27, 3  ;;  %v280_v30 = vand.u32 4294901760, %v279_v21  ;;  %v287_v31 = vand.u32 4294901760, %v286_v22  ;;  %p1122_p1 = scmp.lt.s32.totalorder %s1120_s26, %s1114_s13 }
  0x17   : > { %s142_s5 = scalar_lea.vmem %s1362_s0, %s866_s30  ;;  %1036 = vmatpush3.bf16.msra.mxu0 %v1265_v12  ;;  %1012 = vmatpush3.bf16.msra.mxu1 %v1265_v12  ;;  %v294_v46 = vand.u32 4294901760, %v293_v34  ;;  %v301_v47 = vand.u32 4294901760, %v300_v35  ;;  %p1117_p13 = pneg %p1116_p12 }
  0x18   : > { %v145_v18 = vld [vmem:[%s142_s5] sm:$0xff]  ;;  %v146_v19 = vld [vmem:[%s142_s5 + $0x8] sm:$0xff]  ;;  %v147_v23 = vld [vmem:[%s142_s5 + $0x10] sm:$0xff]  ;;  %1038 = vmatprep.subr.bf16.mxu0 %v1037_v20  ;;  %v1013_v38 = vpack.c.bf16 %v287_v31, %v280_v30  ;;  %p1123_p2 = por %p1122_p1, %p1121_p0 }
  0x19   : > { %v155_v24 = vsel %vm153_vm0, %v145_v18, 0  ;;  %v158_v25 = vsel %vm153_vm0, %v146_v19, 0  ;;  %v161_v26 = vsel %vm153_vm0, %v147_v23, 0  ;;  %v148_v27 = vld [vmem:[%s142_s5 + $0x18] sm:$0xff]  ;;  %v1017_v56 = vpack.c.bf16 %v301_v47, %v294_v46 }
  0x1a   : > { %v1287_v28 = vand.u32 4294901760, %v155_v24  ;;  %v1289_v29 = vand.u32 4294901760, %v158_v25  ;;  %v255_v32 = vand.u32 4294901760, %v161_v26  ;;  %v164_v33 = vsel %vm153_vm0, %v148_v27, 0  ;;  %1014 = vmatprep.subr.bf16.mxu1 %v1013_v38  ;;  %p1124_p3 = pnand %p1123_p2, %p1117_p13 }
  0x1b   : > { %v265_v39 = vand.u32 4294901760, %v164_v33 }
  0x1c   : > { %v236_v36 = vsub.f32 %v155_v24, %v1287_v28  ;;  %v246_v37 = vsub.f32 %v158_v25, %v1289_v29  ;;  %v256_v40 = vsub.f32 %v161_v26, %v255_v32 }
  0x1d   : > { %v266_v43 = vsub.f32 %v164_v33, %v265_v39 }
  0x1e   : > { %v237_v41 = vand.u32 4294901760, %v236_v36  ;;  %v247_v42 = vand.u32 4294901760, %v246_v37  ;;  %v257_v44 = vand.u32 4294901760, %v256_v40 }
  0x1f   : > { %v267_v50 = vand.u32 4294901760, %v266_v43 }
  0x20   : > { %971 = vmatprep.mubr.f32.mxu0 %v237_v41  ;;  %v238_v48 = vsub.f32 %v236_v36, %v237_v41  ;;  %v248_v49 = vsub.f32 %v246_v37, %v247_v42  ;;  %v258_v51 = vsub.f32 %v256_v40, %v257_v44 }
  0x21   : > { %972 = vmatmul.mubr.f32.vlgmr.msra.gmra.mrb[0].mxu0 %v247_v42  ;;  %v268_v54 = vsub.f32 %v266_v43, %v267_v50 }
  0x22   : > { %1040 = vmatpush3.bf16.msra.mxu0 %v1037_v20  ;;  %v239_v52 = vand.u32 4294901760, %v238_v48  ;;  %974 = vmatprep.mubr.f32.mxu0 %v257_v44  ;;  %v249_v53 = vand.u32 4294901760, %v248_v49  ;;  %v259_v55 = vand.u32 4294901760, %v258_v51 }
  0x23   : > { %1042 = vmatprep.subr.bf16.mxu0 %v1041_v45  ;;  %v269_v57 = vand.u32 4294901760, %v268_v54 }
  0x24   : > { %929 = vmatprep.mubr.f32.mxu1 %v239_v52 }
  0x25   : > { %930 = vmatmul.mubr.f32.vlgmr.msra.gmra.mrb[0].mxu1 %v249_v53  ;;  %975 = vmatmul.mubr.f32.gmra.mrb[2].mxu0 %v267_v50 }
  0x26   : > { %1016 = vmatpush3.bf16.msra.mxu1 %v1013_v38  ;;  %1044 = vmatpush3.bf16.msra.mxu0 %v1041_v45 }
  0x27   : > { %932 = vmatprep.mubr.f32.mxu1 %v259_v55  ;;  %1018 = vmatprep.subr.bf16.mxu1 %v1017_v56 }
  0x28   : > { %985 = vmatprep.mubr.f32.mxu0 %v1287_v28  ;;  %1046 = vmatprep.subr.bf16.mxu0 %v1257_v8 }
  0x29   : > { %933 = vmatmul.mubr.f32.gmra.mrb[2].mxu1 %v269_v57  ;;  %986 = vmatmul.mubr.f32.vlgmr.msra.gmra.mrb[0].mxu0 %v1289_v29 }
  0x2a   : > { %1020 = vmatpush3.bf16.msra.mxu1 %v1017_v56  ;;  %1048 = vmatpush3.bf16.msra.mxu0 %v1257_v8 }
  0x2b   : > { %943 = vmatprep.mubr.f32.mxu1 %v1287_v28  ;;  %1022 = vmatprep.subr.bf16.mxu1 %v1021_v58 }
  0x2c   : > { %988 = vmatprep.mubr.f32.mxu0 %v255_v32  ;;  %1050 = vmatprep.subr.bf16.mxu0 %v1265_v12 }
  0x2d   : > { %944 = vmatmul.mubr.f32.vlgmr.msra.gmra.mrb[0].mxu1 %v1289_v29  ;;  %989 = vmatmul.mubr.f32.gmra.mrb[2].mxu0 %v265_v39 }
  0x2e   : > { %1024 = vmatpush3.bf16.msra.mxu1 %v1021_v58  ;;  %1052 = vmatpush3.bf16.msra.mxu0 %v1265_v12 }
  0x2f   : > { %946 = vmatprep.mubr.f32.mxu1 %v255_v32  ;;  %1026 = vmatprep.subr.bf16.mxu1 %v1025_v59 }
  0x30   : > { %999 = vmatprep.mubr.f32.mxu0 %v1287_v28 }
  0x31   : > { %947 = vmatmul.mubr.f32.gmra.mrb[2].mxu1 %v265_v39  ;;  %1000 = vmatmul.mubr.f32.vlgmr.msra.gmra.mrb[0].mxu0 %v1289_v29 }
  0x32   : > { %1028 = vmatpush3.bf16.msra.mxu1 %v1025_v59  ;;  %957 = vmatprep.mubr.f32.mxu1 %v236_v36 }
  0x33   : > { %1002 = vmatprep.mubr.f32.mxu0 %v255_v32 }
  0x35   : > { %958 = vmatmul.mubr.f32.vlgmr.msra.gmra.mrb[0].mxu1 %v246_v37  ;;  %1003 = vmatmul.mubr.f32.gmra.mrb[2].mxu0 %v265_v39 }
  0x36   : > { %960 = vmatprep.mubr.f32.mxu1 %v256_v40 }
  0x39   : > { %961 = vmatmul.mubr.f32.gmra.mrb[2].mxu1 %v266_v43 }
 0x104   : > { %v1001_v60 = vpop.f32.mrb[0].mxu0 }
 0x105   : > { %v758_v61 = vpop.f32.mrb[1].mxu0 }
 0x108   : > { %v959_v62 = vpop.f32.mrb[0].mxu1  ;;  %v1004_v63 = vpop.f32.mrb[2].mxu0 }
 0x109   : > { %v1053_v0 = vadd.f32 %v1001_v60, %v959_v62  ;;  %v460_v1 = vpop.f32.mrb[1].mxu1  ;;  %v770_v2 = vpop.f32.mrb[3].mxu0 }
 0x10a   : > { %v1054_v3 = vadd.f32 %v758_v61, %v460_v1 }
 0x10b   : > { %781 = vst [vmem:[%s137_s8 + $0x8] sm:$0xff] %v1053_v0 }
 0x10c   : > { %780 = vst [vmem:[%s137_s8] sm:$0xff] %v1054_v3  ;;  %v962_v4 = vpop.f32.mrb[2].mxu1 }
 0x10d   : > { %v1055_v5 = vadd.f32 %v1004_v63, %v962_v4  ;;  %v474_v6 = vpop.f32.mrb[3].mxu1 }
 0x10e   : > { %v1056_v7 = vadd.f32 %v770_v2, %v474_v6 }
 0x10f   : > { %783 = vst [vmem:[%s137_s8 + $0x18] sm:$0xff] %v1055_v5 }
 0x110   : > { %782 = vst [vmem:[%s137_s8 + $0x10] sm:$0xff] %v1056_v7 }
 0x111   : > { %1127 = shalt.err (!%p1124_p3)
}
 0x112   : > { %s1128_s27 = scalar_lea.hbm %s1319_s22, 512  ;;  %s1132_s30 = scalar_lea.hbm %s1364_s2, 1024 }
 0x113   : > { %p1129_p4 = scmp.ne.s32.totalorder %s1319_s22, %s1128_s27  ;;  %p1133_p9 = scmp.lt.u32.totalorder %s1319_s22, %s1364_s2 }
 0x114   : > { %p1134_p10 = scmp.lt.u32.totalorder %s1132_s30, %s1128_s27  ;;  %p1136_p12 = scmp.lt.u32.totalorder %s1128_s27, %s1319_s22 }
 0x115   : > { %p1130_p7 = pnand %p1129_p4, %p1234_p5 }
 0x116   : > { %p1135_p11 = por %p1134_p10, %p1133_p9 }
 0x117   : > { %p1131_p8 = pneg %p1130_p7 }
 0x118   : > { %p1137_p13 = por %p1136_p12, %p1135_p11 }
 0x11a   : > { %p1138_p0 = pnand %p1137_p13, %p1131_p8 }
 0x11c   : > { %1141 = shalt.err (!%p1138_p0)
}
 0x11d   : > { %s1179_s5 = smov 128   ;;  %s1180_s6 = smov 8  }
 0x11e   : > { %1073 = dma.vmem_to_hbm [thread:$0]  (%p1234_p5), %s1314_s14, 512, %s1319_s22, %s1321_s23, %s1179_s5, %s1179_s5, %s1180_s6  }
 0x11f PF: > { %p1079_p1 = scmp.ge.s32.totalorder %s1176_s12, 2  ;;  %s813_s7 = sand.u32 1, %s1164_s9  }
 0x120   : > { %s814_s8 = scalar_lea.sflag [#allocation3], %s813_s7 }
 0x121   : > { %p1076_p2 = pnand %p1079_p1, %p1238_p6 }
 0x123   : > { %1159 = dma.done.wait (!%p1076_p2), %s814_s8, 512  }
 0x124   : > { %1161 = vsyncadd (!%p1076_p2), %s814_s8, 4294966784  ;;  %p12_p3 = scmp.ge.s32.totalorder %s1221_s15, 4   ;;  %s1367_s9 = smov %s1168_s10 }
 0x125   : > { %s1368_s10 = smov %s1172_s11  ;;  %s1369_s11 = smov %s1232_s18 }
 0x126   : > { %s1370_s12 = smov %s1221_s15  ;;  %14 = sbr.rel (!%p12_p3) target bundleno = 3 (0x3), region = 63 }
 0x12d   :  { %819 = vsyncpa [#allocation3], 1 }
 0x12e   :  { %821 = vsyncpa [#allocation3 + $0x1], 1 }

</bundles_post_ra>
